<compile_context>
chip_gen: v7x
topology: tpu7x:2x2x1
jax: 0.10.0
libtpu: 0.0.40
codegen_flags: <defaults>
</compile_context>

<pallas_src>
import jax
import jax.numpy as jnp
from jax import lax
from jax.experimental import pallas as pl
from jax.experimental.pallas import tpu as pltpu


def _round_up(x, m):
    return (x + m - 1) // m * m


def _vmem_limit_bytes(frac=0.75, default=48 * 1024 * 1024):
    """Re-derive the scoped-VMEM budget per TPU generation (safe fallback)."""
    get_info = getattr(pltpu, "get_tpu_info", None)
    if get_info is None:
        return default
    try:
        cap = getattr(get_info(), "vmem_capacity_bytes", None)
        return int(cap * frac) if cap else default
    except Exception:
        return default


# ---------------------------------------------------------------------------
# Kernel 1: packed QKV projection -- computed ONCE per (batch, seq-tile).
# ---------------------------------------------------------------------------
def _qkv_proj_kernel(x_ref, w_ref, q_ref, k_ref, v_ref):
    # x_ref: (1, TT, C)   w_ref: (C, 3*HS) = [Wq*C^-0.5 | Wk | Wv]
    # q/k/v_ref: (1, TT, HS), HS is a multiple of 128.
    hs = q_ref.shape[-1]
    qkv = jnp.dot(x_ref[0], w_ref[...], preferred_element_type=jnp.float32)
    # 128-aligned slices -> no intra-vreg lane shuffles.
    q_ref[0] = qkv[:, :hs].astype(q_ref.dtype)
    k_ref[0] = qkv[:, hs:2 * hs].astype(k_ref.dtype)
    v_ref[0] = qkv[:, 2 * hs:].astype(v_ref.dtype)


# ---------------------------------------------------------------------------
# Kernel 2: causal flash attention with online softmax (tq == tk).
# ---------------------------------------------------------------------------
def _flash_attn_kernel(q_ref, k_ref, v_ref, o_ref, m_s, l_s, acc_s):
    qi = pl.program_id(1)
    ki = pl.program_id(2)

    tq = q_ref.shape[1]
    tk = k_ref.shape[1]

    @pl.when(ki == 0)
    def _init():
        m_s[...] = jnp.full_like(m_s, -1e30)
        l_s[...] = jnp.zeros_like(l_s)
        acc_s[...] = jnp.zeros_like(acc_s)

    def _update(masked):
        # q @ k^T contracting the last dims (no explicit k.T transpose).
        s = lax.dot_general(q_ref[0], k_ref[0],
                            (((1,), (1,)), ((), ())),
                            preferred_element_type=jnp.float32)   # (tq, tk)
        if masked:
            # Diagonal block only (tq == tk => q_start == k_start): additive
            # causal bias with local indices.  Row 0 always sees column 0, so
            # every row has >= 1 visible column and l stays > 0.
            row = lax.broadcasted_iota(jnp.int32, (tq, tk), 0)
            col = lax.broadcasted_iota(jnp.int32, (tq, tk), 1)
            s = s + jnp.where(col <= row, 0.0, -1e30)

        m_new = jnp.maximum(m_s[...], s.max(axis=-1, keepdims=True))
        alpha = jnp.exp(m_s[...] - m_new)
        p = jnp.exp(s - m_new)
        l_s[...] = alpha * l_s[...] + p.sum(axis=-1, keepdims=True)
        acc_s[...] = alpha * acc_s[...] + jnp.dot(
            p.astype(v_ref.dtype), v_ref[0],
            preferred_element_type=jnp.float32)
        m_s[...] = m_new

    # Fully-visible past blocks: no mask arithmetic at all.
    @pl.when(ki < qi)
    def _off_diag():
        _update(masked=False)

    # Diagonal block: mask + finalize (last contributing block for this q-tile).
    # Blocks with ki > qi are fully masked: never computed and (via the
    # min-index DMA trick in the wrapper) never re-fetched from HBM.
    @pl.when(ki == qi)
    def _diag_and_finalize():
        _update(masked=True)
        inv_l = pl.reciprocal(l_s[...], approx=True)   # EUP slot, ~free
        o_ref[0] = (acc_s[...] * inv_l).astype(o_ref.dtype)


# ---------------------------------------------------------------------------
# Wrapper
# ---------------------------------------------------------------------------
def self_att_head(x, wq, wk, wv, *, block_t=256):
    """Forward pass of SelfAttHead (eval mode).

    x: (B, T, C); wq/wk/wv: (C, hs) -- nn.Linear weights pre-transposed so
    that y = x @ W.
    """
    B, T, C = x.shape
    hs = wq.shape[1]
    assert wq.shape == (C, hs) and wk.shape == (C, hs) and wv.shape == (C, hs)
    dtype = x.dtype

    # --- padding ------------------------------------------------------------
    # hs -> multiple of 128 (lane-dense stores, aligned packed-QKV slices);
    # T  -> multiple of the sequence tile (no (T,T)-sized fallback tile).
    hs_p = _round_up(hs, 128)
    tt = _round_up(T, 8) if T <= block_t else block_t
    t_p = _round_up(T, tt)
    nt = t_p // tt

    x_p = x if t_p == T else jnp.pad(x, ((0, 0), (0, t_p - T), (0, 0)))

    # Fold the module's C**-0.5 score scale into Wq (host-side, free) and pack
    # [Wq*scale | Wk | Wv] so the projection is ONE wide MXU matmul.
    def _pad_w(w):
        return w if hs_p == hs else jnp.pad(w, ((0, 0), (0, hs_p - hs)))

    w_packed = jnp.concatenate(
        [_pad_w(wq * (C ** -0.5)), _pad_w(wk), _pad_w(wv)], axis=1)  # (C, 3*hs_p)

    vmem_limit = _vmem_limit_bytes()

    # ---- kernel 1: QKV projection (once per (b, seq-tile)) ------------------
    q, k, v = pl.pallas_call(
        _qkv_proj_kernel,
        out_shape=(
            jax.ShapeDtypeStruct((B, t_p, hs_p), dtype),
            jax.ShapeDtypeStruct((B, t_p, hs_p), dtype),
            jax.ShapeDtypeStruct((B, t_p, hs_p), dtype),
        ),
        grid_spec=pltpu.PrefetchScalarGridSpec(
            num_scalar_prefetch=0,
            grid=(B, nt),
            in_specs=[
                pl.BlockSpec((1, tt, C), lambda b, i: (b, i, 0)),
                # grid-invariant packed weight: fetched once, re-DMA elided.
                pl.BlockSpec((C, 3 * hs_p), lambda b, i: (0, 0)),
            ],
            out_specs=(
                pl.BlockSpec((1, tt, hs_p), lambda b, i: (b, i, 0)),
                pl.BlockSpec((1, tt, hs_p), lambda b, i: (b, i, 0)),
                pl.BlockSpec((1, tt, hs_p), lambda b, i: (b, i, 0)),
            ),
        ),
        compiler_params=pltpu.CompilerParams(
            dimension_semantics=("parallel", "parallel"),
            vmem_limit_bytes=vmem_limit,
        ),
    )(x_p, w_packed)

    # ---- kernel 2: causal flash attention -----------------------------------
    out = pl.pallas_call(
        _flash_attn_kernel,
        out_shape=jax.ShapeDtypeStruct((B, t_p, hs_p), dtype),
        grid_spec=pltpu.PrefetchScalarGridSpec(
            num_scalar_prefetch=0,
            grid=(B, nt, nt),
            in_specs=[
                pl.BlockSpec((1, tt, hs_p), lambda b, qi, ki: (b, qi, 0)),
                # Fully-masked future blocks (ki > qi) re-use the resident
                # block (index unchanged vs previous step) -> no HBM traffic.
                pl.BlockSpec((1, tt, hs_p),
                             lambda b, qi, ki: (b, jnp.minimum(ki, qi), 0)),
                pl.BlockSpec((1, tt, hs_p),
                             lambda b, qi, ki: (b, jnp.minimum(ki, qi), 0)),
            ],
            out_specs=pl.BlockSpec((1, tt, hs_p), lambda b, qi, ki: (b, qi, 0)),
            scratch_shapes=[
                pltpu.VMEM((tt, 1), jnp.float32),      # running max
                pltpu.VMEM((tt, 1), jnp.float32),      # running denom
                pltpu.VMEM((tt, hs_p), jnp.float32),   # output accumulator
            ],
        ),
        compiler_params=pltpu.CompilerParams(
            # (B, q-tiles) parallel so the grid splits across v7x's 2 TCs.
            dimension_semantics=("parallel", "parallel", "arbitrary"),
            vmem_limit_bytes=vmem_limit,
        ),
    )(q, k, v)

    # Strip the hs / T padding (padded key columns were auto-masked by the
    # causal mask; padded query rows are sliced away here).
    return out[:, :T, :hs]


def _reference(x, wq, wk, wv):
    """Plain-JAX reference mirroring the PyTorch forward (eval mode)."""
    B, T, C = x.shape
    q = x @ wq
    k = x @ wk
    v = x @ wv
    wei = jnp.einsum("btd,bsd->bts", q, k) * (C ** -0.5)
    tril = jnp.tril(jnp.ones((T, T), dtype=bool))
    wei = jnp.where(tril, wei, -jnp.inf)
    wei = jax.nn.softmax(wei, axis=-1)
    return wei @ v   # dropout is identity in eval mode


if __name__ == "__main__":
    key = jax.random.PRNGKey(0)
    k_x, k_q, k_k, k_v, k_x2 = jax.random.split(key, 5)

    # --- small spec-sized case (single tile, hs padded 16 -> 128) ------------
    B, T, n_embed, head_size = 2, 8, 32, 16
    x = jax.random.normal(k_x, (B, T, n_embed), dtype=jnp.float32)
    bound = 1.0 / (n_embed ** 0.5)
    wq = jax.random.uniform(k_q, (n_embed, head_size), jnp.float32, -bound, bound)
    wk = jax.random.uniform(k_k, (n_embed, head_size), jnp.float32, -bound, bound)
    wv = jax.random.uniform(k_v, (n_embed, head_size), jnp.float32, -bound, bound)

    out = jax.block_until_ready(self_att_head(x, wq, wk, wv))
    ref = _reference(x, wq, wk, wv)
    assert out.shape == (B, T, head_size)
    # approx reciprocal on the EUP is accurate to ~1e-4 rel; allow margin.
    assert jnp.allclose(out, ref, atol=2e-3, rtol=2e-3), "mismatch vs reference (small)"

    # --- multi-tile case (exercises tiling, T padding, causal block skip) ----
    T2 = 300
    x2 = jax.random.normal(k_x2, (B, T2, n_embed), dtype=jnp.float32)
    out2 = jax.block_until_ready(self_att_head(x2, wq, wk, wv, block_t=128))
    ref2 = _reference(x2, wq, wk, wv)
    assert out2.shape == (B, T2, head_size)
    assert jnp.allclose(out2, ref2, atol=2e-3, rtol=2e-3), "mismatch vs reference (tiled)"

    print("KERNEL_OK")
</pallas_src>

<mosaic_0001>
module attributes {stable_mosaic.version = 11 : i64} {
  func.func @_qkv_proj_kernel(%arg0: i32, %arg1: i32, %arg2: memref<1x8x32xf32, #tpu.memory_space<vmem>>, %arg3: memref<32x384xf32, #tpu.memory_space<vmem>>, %arg4: memref<1x8x128xf32, #tpu.memory_space<vmem>>, %arg5: memref<1x8x128xf32, #tpu.memory_space<vmem>>, %arg6: memref<1x8x128xf32, #tpu.memory_space<vmem>>) attributes {dimension_semantics = [#tpu.dimension_semantics<parallel>, #tpu.dimension_semantics<parallel>], iteration_bounds = array<i64: 2, 1>, scalar_prefetch = 0 : i64, scratch_operands = 0 : i64, tpu.core_type = #tpu.core_type<tc>, window_params = [{transform_indices = @transform_0, window_bounds = array<i64: 1, 8, 32>}, {pipeline_mode = #tpu.pipeline_mode<synchronous>, transform_indices = @transform_1, window_bounds = array<i64: 32, 384>}, {transform_indices = @transform_2, window_bounds = array<i64: 1, 8, 128>}, {transform_indices = @transform_3, window_bounds = array<i64: 1, 8, 128>}, {transform_indices = @transform_4, window_bounds = array<i64: 1, 8, 128>}]} {
    %c0 = arith.constant 0 : index
    %c0_0 = arith.constant 0 : index
    %c0_1 = arith.constant 0 : index
    %0 = vector.load %arg2[%c0, %c0_0, %c0_1] : memref<1x8x32xf32, #tpu.memory_space<vmem>>, vector<1x8x32xf32>
    %1 = vector.shape_cast %0 : vector<1x8x32xf32> to vector<8x32xf32>
    %c0_2 = arith.constant 0 : index
    %c0_3 = arith.constant 0 : index
    %2 = vector.load %arg3[%c0_2, %c0_3] : memref<32x384xf32, #tpu.memory_space<vmem>>, vector<32x384xf32>
    %cst = arith.constant dense<0.000000e+00> : vector<8x384xf32>
    %3 = tpu.matmul %1, %2, %cst {dimension_numbers = #tpu.dot_dimension_numbers<[1], [0], [0], [1], [0, 0, 1, 1], [], []>} : vector<8x32xf32>, vector<32x384xf32>, vector<8x384xf32> -> vector<8x384xf32>
    %4 = vector.extract_strided_slice %3 {offsets = [0, 0], sizes = [8, 128], strides = [1, 1]} : vector<8x384xf32> to vector<8x128xf32>
    %c0_4 = arith.constant 0 : index
    %c0_5 = arith.constant 0 : index
    %c0_6 = arith.constant 0 : index
    %5 = vector.load %arg4[%c0_4, %c0_5, %c0_6] : memref<1x8x128xf32, #tpu.memory_space<vmem>>, vector<1x8x128xf32>
    %6 = vector.shape_cast %5 : vector<1x8x128xf32> to vector<8x128xf32>
    %7 = vector.shape_cast %4 : vector<8x128xf32> to vector<1x8x128xf32>
    tpu.vector_store %arg4[%c0_4, %c0_5, %c0_6], %7 {strides = array<i32>} : memref<1x8x128xf32, #tpu.memory_space<vmem>>, vector<1x8x128xf32>,
    %8 = vector.extract_strided_slice %3 {offsets = [0, 128], sizes = [8, 128], strides = [1, 1]} : vector<8x384xf32> to vector<8x128xf32>
    %c0_7 = arith.constant 0 : index
    %c0_8 = arith.constant 0 : index
    %c0_9 = arith.constant 0 : index
    %9 = vector.load %arg5[%c0_7, %c0_8, %c0_9] : memref<1x8x128xf32, #tpu.memory_space<vmem>>, vector<1x8x128xf32>
    %10 = vector.shape_cast %9 : vector<1x8x128xf32> to vector<8x128xf32>
    %11 = vector.shape_cast %8 : vector<8x128xf32> to vector<1x8x128xf32>
    tpu.vector_store %arg5[%c0_7, %c0_8, %c0_9], %11 {strides = array<i32>} : memref<1x8x128xf32, #tpu.memory_space<vmem>>, vector<1x8x128xf32>,
    %12 = vector.extract_strided_slice %3 {offsets = [0, 256], sizes = [8, 128], strides = [1, 1]} : vector<8x384xf32> to vector<8x128xf32>
    %c0_10 = arith.constant 0 : index
    %c0_11 = arith.constant 0 : index
    %c0_12 = arith.constant 0 : index
    %13 = vector.load %arg6[%c0_10, %c0_11, %c0_12] : memref<1x8x128xf32, #tpu.memory_space<vmem>>, vector<1x8x128xf32>
    %14 = vector.shape_cast %13 : vector<1x8x128xf32> to vector<8x128xf32>
    %15 = vector.shape_cast %12 : vector<8x128xf32> to vector<1x8x128xf32>
    tpu.vector_store %arg6[%c0_10, %c0_11, %c0_12], %15 {strides = array<i32>} : memref<1x8x128xf32, #tpu.memory_space<vmem>>, vector<1x8x128xf32>,
    return
  }
  func.func @transform_0(%arg0: i32, %arg1: i32) -> (i32, i32, i32) {
    %c0_i32 = arith.constant 0 : i32
    %c0_i32_0 = arith.constant 0 : i32
    return %arg0, %arg1, %c0_i32 : i32, i32, i32
  }
  func.func @transform_1(%arg0: i32, %arg1: i32) -> (i32, i32) {
    %c0_i32 = arith.constant 0 : i32
    %c0_i32_0 = arith.constant 0 : i32
    %c0_i32_1 = arith.constant 0 : i32
    return %c0_i32, %c0_i32_0 : i32, i32
  }
  func.func @transform_2(%arg0: i32, %arg1: i32) -> (i32, i32, i32) {
    %c0_i32 = arith.constant 0 : i32
    %c0_i32_0 = arith.constant 0 : i32
    return %arg0, %arg1, %c0_i32 : i32, i32, i32
  }
  func.func @transform_3(%arg0: i32, %arg1: i32) -> (i32, i32, i32) {
    %c0_i32 = arith.constant 0 : i32
    %c0_i32_0 = arith.constant 0 : i32
    return %arg0, %arg1, %c0_i32 : i32, i32, i32
  }
  func.func @transform_4(%arg0: i32, %arg1: i32) -> (i32, i32, i32) {
    %c0_i32 = arith.constant 0 : i32
    %c0_i32_0 = arith.constant 0 : i32
    return %arg0, %arg1, %c0_i32 : i32, i32, i32
  }
}

</mosaic_0001>

<bundles_post_ra>
// kernel: tpu_custom_call.1
= control target key start
LH: loop header
LB: loop body
LE: loop exit
PB: predicated region body
PF: predicated region fallthrough
CT: control target
= control target key end

     0   :  { %s1301_s0 = inlined_call_operand.hbm [shape: f32[2,8,32], index: 0, kind: input, shape index: {}]   ;;  %s1302_s1 = inlined_call_operand.hbm [shape: f32[32,384], index: 1, kind: input, shape index: {}]   ;;  %s1303_s2 = inlined_call_operand.hbm [shape: f32[2,8,128], index: 2, kind: output, shape index: {0}]   ;;  %s1304_s3 = inlined_call_operand.hbm [shape: f32[2,8,128], index: 3, kind: output, shape index: {1}]   ;;  %s1305_s4 = inlined_call_operand.hbm [shape: f32[2,8,128], index: 4, kind: output, shape index: {2}]  }
   0x1   :  { %1310 = sst [smem:[#allocation15_spill]] %s1301_s0 }
   0x2   :  { %10 = vsyncpa [#allocation3], 0 }
   0x3   :  { %12 = vsyncpa [#allocation3 + $0x1], 0 }
   0x4   :  { %13 = vsyncpa [#allocation6], 0 }
   0x5   :  { %14 = vsyncpa [#allocation4], 0 }
   0x6   :  { %16 = vsyncpa [#allocation4 + $0x1], 0 }
   0x7   :  { %17 = vsyncpa [#allocation9], 0 }
   0x8   :  { %19 = vsyncpa [#allocation9 + $0x1], 0  ;;  %s1016_s15 = smov 0   ;;  %s1018_s16 = smov 0  }
   0x9   :  { %s1020_s17 = smov 0   ;;  %s1022_s18 = smov 0  }
   0xa   :  { %s1024_s19 = smov 0   ;;  %s1026_s20 = smov 0  }
   0xb LB: > { %s1047_s21 = sadd.s32 4294967295, %s979_s20   ;;  %s1309_s22 = sadd.s32 4294967294, %s979_s20   ;;  %s979_s20 = sphi %s1026_s20, %s25_s20   ;;  %s975_s19 = sphi %s1024_s19, %s1332_s19   ;;  %s971_s18 = sphi %s1022_s18, %s1331_s18   ;;  %s967_s17 = sphi %s1020_s17, %s1330_s17   ;;  %s963_s16 = sphi %s1018_s16, %s1329_s16   ;;  %s959_s15 = sphi %s1016_s15, %s1328_s15  }
   0xc   : > { %p59_p0 = scmp.ne.s32.totalorder %s963_s16, %s959_s15  ;;  %p1306_p1 = scmp.eq.s32.totalorder %s1047_s21, 0 }
   0xd   : > { %p112_p3 = scmp.eq.s32.totalorder %s1309_s22, 1  ;;  %p636_p5 = scmp.ge.s32.totalorder %s979_s20, 1 }
   0xe   : > { %p1058_p4 = por %p1306_p1, %p59_p0  ;;  %p175_p7 = scmp.lt.s32.totalorder %s979_s20, 3 }
   0xf   : > { %p1063_p6 = por %p112_p3, %p59_p0  ;;  %s981_s26 = smov [#allocation5]  }
  0x10   : > { %s1311_s23 = scalar_select %p1058_p4, 1, 0 }
  0x11   : > { %s1312_s24 = scalar_select %p1063_p6, 1, 0 }
  0x12   : > { %p1068_p8 = pnand %p636_p5, %p175_p7  ;;  %s187_s27 = sshll.u32 %s981_s26, 4  ;;  %s188_s27 = int_to_ptr.vmem [resolvable:$true] %s187_s27 }
  0x13   : > { %s37_s29 = sadd.s32 1, %s975_s19  ;;  %s775_s6 = scalar_lea.hbm %s1302_s1, 1536 }
  0x14   : > { %s1313_s25 = scalar_select %p1068_p8, 1, 0 }
  0x15   : > { %p699_p9 = pneg %p1068_p8  ;;  %p776_p12 = scmp.ne.s32.totalorder %s1302_s1, %s775_s6 }
  0x16   : > { %p782_p5 = scmp.lt.u32.totalorder %s775_s6, %s1302_s1 }
  0x17   : > { %p1077_p11 = pnand %p699_p9, %p1306_p1 }
  0x19   : > { %p777_p13 = pneg %p1077_p11 }
  0x1b   : > { %p778_p0 = pnand %p777_p13, %p776_p12 }
  0x1d   : > { %p779_p3 = pneg %p778_p0 }
  0x1f   : > { %p784_p7 = pnand %p782_p5, %p779_p3 }
  0x21   : > { %787 = shalt.err (!%p784_p7)
}
  0x22   : > { %s788_s11 = scalar_lea.vmem %s188_s27, 1536  ;;  %p796_p2 = scmp.lt.s32.totalorder %s188_s27, %s188_s27 }
  0x23   : > { %p789_p9 = scmp.ne.s32.totalorder %s188_s27, %s788_s11  ;;  %p797_p6 = scmp.lt.s32.totalorder %s788_s11, %s788_s11 }
  0x25   : > { %p791_p10 = pnand %p789_p9, %p777_p13  ;;  %p798_p4 = por %p797_p6, %p796_p2 }
  0x27   : > { %p792_p1 = pneg %p791_p10 }
  0x29   : > { %p799_p8 = pnand %p798_p4, %p792_p1 }
  0x2b   : > { %802 = shalt.err (!%p799_p8)
}
  0x2c   : > { %s982_s12 = smov 384   ;;  %s983_s13 = smov 24  }
  0x2d   : > { %702 = dma.hbm_to_vmem [thread:$0]  (!%p1077_p11), %s1302_s1, 1536, %s188_s27, [#allocation6], %s982_s12, %s982_s12, %s983_s13  }
  0x2e   : > { %p39_p1 = scmp.ge.s32.totalorder %s37_s29, 2  ;;  %s46_s30 = sadd.s32 1, %s967_s17 }
  0x2f   : > { %p53_p2 = scmp.ne.s32.totalorder %s967_s17, %s963_s16  ;;  %p54_p4 = scmp.eq.s32.totalorder %s979_s20, 0 }
  0x30   : > { %s1334_s29 = smov (%p39_p1, %s37_s29), 0  ;;  %p1316_p8 = scmp.eq.s32.totalorder %s1047_s21, 1 }
  0x31   : > { %p1104_p6 = por %p54_p4, %p53_p2  ;;  %s41_s28 = ssub.s32 %s975_s19, %s1334_s29 }
  0x32   : > { %p1110_p10 = por %p1316_p8, %p53_p2  ;;  %p718_p12 = scmp.lt.s32.totalorder %s979_s20, 2 }
  0x33   : > { %p44_p11 = scmp.eq.s32.totalorder %s41_s28, 0  ;;  %s201_s27 = sand.u32 1, %s967_s17  }
  0x34   : > { %s639_s7 = sshll.u32 %s201_s27, 3  ;;  %s640_s9 = sshll.u32 %s975_s19, 7 }
  0x35   : > { %s1119_s8 = scalar_select %p44_p11, %s967_s17, %s46_s30  }
  0x36   : > { %s1318_s0 = sld [smem:[#allocation15_spill]]  ;;  %s205_s13 = scalar_lea.vmem [#allocation2], %s639_s7 }
  0x37   : > { %s213_s14 = sshll.u32 %s205_s13, 4  ;;  %p1131_p13 = pnand %p718_p12, %p1104_p6  ;;  %s1127_s14 = int_to_ptr.vmem [resolvable:$true] %s213_s14 }
  0x38   : > { %s202_s30 = scalar_lea.sflag [#allocation3], %s201_s27 }
  0x39   : > { %p805_p3 = pneg %p1131_p13 }
  0x3c   : > { %s1125_s12 = scalar_lea.hbm %s1318_s0, %s640_s9  ;;  %s808_s10 = scalar_lea.hbm %s1318_s0, 256 }
  0x3d   : > { %s803_s28 = scalar_lea.hbm %s1125_s12, 128  ;;  %p809_p9 = scmp.lt.u32.totalorder %s1125_s12, %s1318_s0 }
  0x3e   : > { %p804_p0 = scmp.ne.s32.totalorder %s1125_s12, %s803_s28  ;;  %p810_p1 = scmp.lt.u32.totalorder %s808_s10, %s803_s28 }
  0x3f   : > { %p812_p4 = scmp.lt.u32.totalorder %s803_s28, %s1125_s12 }
  0x40   : > { %p806_p5 = pnand %p805_p3, %p804_p0  ;;  %p811_p2 = por %p810_p1, %p809_p9 }
  0x42   : > { %p807_p7 = pneg %p806_p5  ;;  %p813_p6 = por %p812_p4, %p811_p2 }
  0x44   : > { %p814_p8 = pnand %p813_p6, %p807_p7 }
  0x46   : > { %817 = shalt.err (!%p814_p8)
}
  0x47   : > { %s818_s27 = scalar_lea.vmem %s1127_s14, 128  ;;  %s984_s13 = smov [#allocation2]  }
  0x48   : > { %p819_p12 = scmp.ne.s32.totalorder %s1127_s14, %s818_s27  ;;  %s823_s7 = sshll.u32 %s984_s13, 4  ;;  %s824_s7 = int_to_ptr.vmem [resolvable:$false] %s823_s7 }
  0x49   : > { %s825_s9 = scalar_lea.vmem %s824_s7, 256  ;;  %p826_p5 = scmp.lt.s32.totalorder %s1127_s14, %s824_s7 }
  0x4a   : > { %p821_p11 = pnand %p819_p12, %p805_p3  ;;  %p827_p9 = scmp.lt.s32.totalorder %s825_s9, %s818_s27 }
  0x4c   : > { %p822_p0 = pneg %p821_p11  ;;  %p828_p1 = por %p827_p9, %p826_p5 }
  0x4e   : > { %p829_p2 = pnand %p828_p1, %p822_p0 }
  0x50   : > { %832 = shalt.err (!%p829_p2)
}
  0x51   : > { %706 = dma.hbm_to_vmem [thread:$0]  (!%p1131_p13), %s1125_s12, 128, %s1127_s14, %s202_s30  }
  0x52   : > { %p1320_p7 = scmp.ne.s32.totalorder %s1313_s25, 0 }
  0x53   : > { %s1163_s28 = sand.u32 (!%p1320_p7), 1, %s963_s16   ;;  %p1321_p3 = scmp.ne.s32.totalorder (!%p1320_p7), %s1311_s23, 0 }
  0x54   : > { %222 = sbr.rel (%p1320_p7) target bundleno = 385 (0x181), region = 28  ;;  %s1166_s10 = sshll.u32 (!%p1320_p7), %s1163_s28, 3 }
  0x55   : > { %s225_s5 = scalar_lea.sflag (!%p1320_p7), [#allocation3], %s1163_s28  ;;  %s228_s11 = scalar_lea.vmem (!%p1320_p7), [#allocation2], %s1166_s10 }
  0x5b   : > { %942 = dma.done.wait (%p1321_p3), %s225_s5, 128  }
  0x5c   : > { %944 = vsyncadd (%p1321_p3), %s225_s5, 4294967168  ;;  %p1322_p13 = scmp.eq.s32.totalorder %s1047_s21, 0 }
  0x5e   : > { %946 = dma.done.wait (%p1322_p13), [#allocation6], 1536   ;;  %p1323_p4 = pmov %p1322_p13 }
  0x5f   : > { %v985_v0 = vmov 0.0|0.0   ;;  %v986_v1 = vmov 0.0   ;;  %vm987_vm0 = vmmov 0   ;;  %v269_v2 = vld [vmem:[#allocation5 + $0x8] sm:$0xff]  ;;  %v272_v3 = vld [vmem:[#allocation5 + $0x20] sm:$0xff]  ;;  %v271_v6 = vld [vmem:[#allocation5 + $0x18] sm:$0xff] }
  0x60   : > { %948 = vsyncadd (%p1323_p4), [#allocation6], 4294965760  ;;  %681 = vmatprep.subr.bf16.mxu1 %v985_v0  ;;  %348 = vmatprep.mubr.f32.mxu0 %v986_v1  ;;  %v268_v4 = vld [vmem:[#allocation5] sm:$0xff]  ;;  %v673_v5 = vpack.c.bf16 %v272_v3, %v269_v2  ;;  %v270_v7 = vld [vmem:[#allocation5 + $0x10] sm:$0xff]  ;;  %vm280_vm1 = vcmask 261120   ;;  %s252_s23 = scalar_lea.vmem [#allocation7], %s1166_s10 }
  0x61   : > { %670 = vmatprep.mubr.msk.f32.mxu1 %vm987_vm0, %v986_v1  ;;  %v273_v8 = vld [vmem:[#allocation5 + $0x28] sm:$0xff]  ;;  %v675_v9 = vpack.c.bf16 %v271_v6, %v268_v4  ;;  %v275_v11 = vld [vmem:[#allocation5 + $0x38] sm:$0xff]  ;;  %v278_v12 = vld [vmem:[#allocation5 + $0x50] sm:$0xff]  ;;  %s453_s25 = sshll.u32 %s252_s23, 4  ;;  %s259_s12 = scalar_lea.vmem [#allocation8], %s1166_s10  ;;  %s1183_s25 = int_to_ptr.vmem [resolvable:$true] %s453_s25 }
  0x62   : > { %v682_v10 = vpack.c.bf16 %v273_v8, %v270_v7  ;;  %v274_v13 = vld [vmem:[#allocation5 + $0x30] sm:$0xff]  ;;  %674 = vmatprep.subr.bf16.mxu0 %v673_v5  ;;  %v677_v14 = vpack.c.bf16 %v278_v12, %v275_v11  ;;  %v277_v15 = vld [vmem:[#allocation5 + $0x48] sm:$0xff]  ;;  %v276_v16 = vld [vmem:[#allocation5 + $0x40] sm:$0xff]  ;;  %s467_s14 = sshll.u32 %s259_s12, 4  ;;  %s652_s26 = sshll.u32 %s971_s18, 7  ;;  %s1186_s14 = int_to_ptr.vmem [resolvable:$true] %s467_s14 }
  0x63   : > { %v279_v17 = vld [vmem:[#allocation5 + $0x58] sm:$0xff]  ;;  %676 = vmatpush1.bf16.msra.mxu0 %v675_v9  ;;  %v679_v18 = vpack.c.bf16 %v277_v15, %v274_v13  ;;  %s266_s27 = scalar_lea.vmem [#allocation10], %s1166_s10  ;;  %s1192_s5 = scalar_lea.hbm %s1303_s2, %s652_s26 }
  0x64   : > { %683 = vmatpush3.bf16.msra.mxu1 %v682_v10  ;;  %v685_v19 = vpack.c.bf16 %v279_v17, %v276_v16  ;;  %678 = vmatprep.subr.bf16.mxu0 %v677_v14  ;;  %v267_v20 = vld [vmem:[%s228_s11] sm:$0xff]  ;;  %s481_s13 = sshll.u32 %s266_s27, 4  ;;  %s1197_s22 = scalar_lea.hbm %s1304_s3, %s652_s26  ;;  %s1199_s13 = int_to_ptr.vmem [resolvable:$true] %s481_s13 }
  0x65   : > { %684 = vmatprep.subr.bf16.mxu1 %v985_v0  ;;  %s1204_s7 = scalar_lea.hbm %s1305_s4, %s652_s26  ;;  %s429_s9 = scalar_lea.sflag [#allocation4], %s1163_s28 }
  0x66   : > { %s833_s0 = scalar_lea.vmem %s1183_s25, 128  ;;  %s988_s11 = smov [#allocation7]  }
  0x67   : > { %680 = vmatpush1.bf16.msra.mxu0 %v679_v18  ;;  %p834_p6 = scmp.ne.s32.totalorder %s1183_s25, %s833_s0 }
  0x68   : > { %686 = vmatpush3.bf16.msra.mxu1 %v685_v19 }
  0x69   : > { %p835_p8 = pnand %p834_p6, %p1110_p10 }
  0x6a   : > { %647 = vmatmul.mubr.msk.f32.vlgmr.msra.gmra.mrb[0].mxu0 %vm280_vm1, %v267_v20 }
  0x6b   : > { %671 = vmatmul.mubr.msk.f32.vlgmr.msra.gmra.mrb[0].mxu1 %vm280_vm1, %v267_v20  ;;  %p836_p12 = pneg %p835_p8 }
 0x13d   : > { %v350_v21 = vpop.f32.mrb[0].mxu0 }
 0x13e   : > { %v421_v22 = vpop.f32.mrb[0].mxu1  ;;  %425 = vst [vmem:[%s252_s23] sm:$0xff] %v350_v21  ;;  %v352_v23 = vpop.f32.mrb[1].mxu0  ;;  %s837_s23 = sshll.u32 %s988_s11, 4  ;;  %s838_s23 = int_to_ptr.vmem [resolvable:$false] %s837_s23 }
 0x13f   : > { %427 = vst [vmem:[%s266_s27] sm:$0xff] %v421_v22  ;;  %v672_v24 = vpop.f32.mrb[1].mxu1  ;;  %426 = vst [vmem:[%s259_s12] sm:$0xff] %v352_v23  ;;  %s839_s18 = scalar_lea.vmem %s838_s23, 256  ;;  %p840_p11 = scmp.lt.s32.totalorder %s1183_s25, %s838_s23 }
 0x140   : > { %p841_p0 = scmp.lt.s32.totalorder %s839_s18, %s833_s0 }
 0x142   : > { %p842_p5 = por %p841_p0, %p840_p11 }
 0x144   : > { %p843_p9 = pnand %p842_p5, %p836_p12 }
 0x146   : > { %846 = shalt.err (!%p843_p9)
}
 0x147   : > { %s847_s28 = scalar_lea.hbm %s1192_s5, 128  ;;  %s851_s30 = scalar_lea.hbm %s1303_s2, 256 }
 0x148   : > { %p848_p1 = scmp.ne.s32.totalorder %s1192_s5, %s847_s28  ;;  %p852_p3 = scmp.lt.u32.totalorder %s1192_s5, %s1303_s2 }
 0x149   : > { %p853_p13 = scmp.lt.u32.totalorder %s851_s30, %s847_s28  ;;  %p855_p6 = scmp.lt.u32.totalorder %s847_s28, %s1192_s5 }
 0x14a   : > { %p849_p2 = pnand %p848_p1, %p1110_p10 }
 0x14b   : > { %p854_p4 = por %p853_p13, %p852_p3 }
 0x14c   : > { %p850_p7 = pneg %p849_p2 }
 0x14d   : > { %p856_p8 = por %p855_p6, %p854_p4 }
 0x14f   : > { %p857_p12 = pnand %p856_p8, %p850_p7 }
 0x151   : > { %860 = shalt.err (!%p857_p12)
}
 0x152   : > { %693 = dma.vmem_to_hbm [thread:$0]  (%p1110_p10), %s1183_s25, 128, %s1192_s5, %s429_s9  }
 0x153   : > { %s1324_s0 = sand.u32 1, %s1047_s21   ;;  %s861_s23 = scalar_lea.vmem %s1186_s14, 128 }
 0x154   : > { %s1230_s11 = scalar_lea.sflag [#allocation9], %s1324_s0  ;;  %p862_p11 = scmp.ne.s32.totalorder %s1186_s14, %s861_s23 }
 0x155   : > { %s989_s18 = smov [#allocation8]  }
 0x156   : > { %p863_p0 = pnand %p862_p11, %p1110_p10  ;;  %s865_s28 = sshll.u32 %s989_s18, 4  ;;  %s866_s28 = int_to_ptr.vmem [resolvable:$false] %s865_s28 }
 0x157   : > { %s867_s12 = scalar_lea.vmem %s866_s28, 256  ;;  %p868_p9 = scmp.lt.s32.totalorder %s1186_s14, %s866_s28 }
 0x158   : > { %p864_p5 = pneg %p863_p0  ;;  %p869_p1 = scmp.lt.s32.totalorder %s867_s12, %s861_s23 }
 0x15a   : > { %p870_p2 = por %p869_p1, %p868_p9 }
 0x15c   : > { %p871_p7 = pnand %p870_p2, %p864_p5 }
 0x15e   : > { %874 = shalt.err (!%p871_p7)
}
 0x15f   : > { %s875_s21 = scalar_lea.hbm %s1197_s22, 128  ;;  %s879_s9 = scalar_lea.hbm %s1304_s3, 256 }
 0x160   : > { %p876_p3 = scmp.ne.s32.totalorder %s1197_s22, %s875_s21  ;;  %p880_p6 = scmp.lt.u32.totalorder %s1197_s22, %s1304_s3 }
 0x161   : > { %p881_p8 = scmp.lt.u32.totalorder %s879_s9, %s875_s21  ;;  %p883_p11 = scmp.lt.u32.totalorder %s875_s21, %s1197_s22 }
 0x162   : > { %p877_p13 = pnand %p876_p3, %p1110_p10 }
 0x163   : > { %p882_p12 = por %p881_p8, %p880_p6 }
 0x164   : > { %p878_p4 = pneg %p877_p13 }
 0x165   : > { %p884_p0 = por %p883_p11, %p882_p12 }
 0x167   : > { %p885_p5 = pnand %p884_p0, %p878_p4 }
 0x169   : > { %888 = shalt.err (!%p885_p5)
}
 0x16a   : > { %694 = dma.vmem_to_hbm [thread:$0]  (%p1110_p10), %s1186_s14, 128, %s1197_s22, %s1230_s11  }
 0x16b   : > { %s889_s27 = scalar_lea.vmem %s1199_s13, 128  ;;  %s990_s10 = smov [#allocation10]  }
 0x16c   : > { %p890_p9 = scmp.ne.s32.totalorder %s1199_s13, %s889_s27  ;;  %s893_s0 = sshll.u32 %s990_s10, 4  ;;  %s894_s0 = int_to_ptr.vmem [resolvable:$false] %s893_s0 }
 0x16d   : > { %s895_s23 = scalar_lea.vmem %s894_s0, 256  ;;  %p896_p7 = scmp.lt.s32.totalorder %s1199_s13, %s894_s0 }
 0x16e   : > { %p891_p1 = pnand %p890_p9, %p1110_p10  ;;  %p897_p3 = scmp.lt.s32.totalorder %s895_s23, %s889_s27 }
 0x170   : > { %p892_p2 = pneg %p891_p1  ;;  %p898_p13 = por %p897_p3, %p896_p7 }
 0x172   : > { %p899_p4 = pnand %p898_p13, %p892_p2 }
 0x174   : > { %902 = shalt.err (!%p899_p4)
}
 0x175   : > { %s903_s22 = scalar_lea.hbm %s1204_s7, 128  ;;  %s907_s28 = scalar_lea.hbm %s1305_s4, 256 }
 0x176   : > { %p904_p6 = scmp.ne.s32.totalorder %s1204_s7, %s903_s22  ;;  %p908_p11 = scmp.lt.u32.totalorder %s1204_s7, %s1305_s4 }
 0x177   : > { %p909_p0 = scmp.lt.u32.totalorder %s907_s28, %s903_s22  ;;  %p911_p9 = scmp.lt.u32.totalorder %s903_s22, %s1204_s7 }
 0x178   : > { %p905_p8 = pnand %p904_p6, %p1110_p10 }
 0x179   : > { %p910_p5 = por %p909_p0, %p908_p11 }
 0x17a   : > { %p906_p12 = pneg %p905_p8 }
 0x17b   : > { %p912_p1 = por %p911_p9, %p910_p5 }
 0x17d   : > { %p913_p2 = pnand %p912_p1, %p906_p12 }
 0x17f   : > { %916 = shalt.err (!%p913_p2)
}
 0x180   : > { %695 = dma.vmem_to_hbm [thread:$0]  (%p1110_p10), %s1199_s13, 128, %s1204_s7, %s1230_s11  }
 0x181 PF: > { %s493_s25 = sand.u32 1, %s959_s15   ;;  %p1325_p7 = scmp.ne.s32.totalorder %s1312_s24, 0 }
 0x182   : > { %p1326_p3 = scmp.ge.s32.totalorder %s979_s20, 2  ;;  %s494_s5 = scalar_lea.sflag [#allocation4], %s493_s25 }
 0x184   : > { %p708_p13 = pnand %p1326_p3, %p1325_p7 }
 0x186   : > { %950 = dma.done.wait (!%p708_p13), %s494_s5, 128  }
 0x187   : > { %952 = vsyncadd (!%p708_p13), %s494_s5, 4294967168  ;;  %s1327_s9 = sadd.s32 4294967294, %s979_s20  }
 0x188   : > { %s502_s26 = sand.u32 1, %s1327_s9  }
 0x189   : > { %s503_s30 = scalar_lea.sflag [#allocation9], %s502_s26 }
 0x18a   : > { %954 = dma.done.wait (!%p708_p13), %s503_s30, 256  }
 0x18b   : > { %956 = vsyncadd (!%p708_p13), %s503_s30, 4294967040  ;;  %s25_s20 = sadd.s32 1, %s979_s20   ;;  %s1328_s15 = smov %s963_s16 }
 0x18c   : > { %p22_p10 = scmp.ge.s32.totalorder %s25_s20, 4   ;;  %s1329_s16 = smov %s967_s17 }
 0x18d   : > { %s1330_s17 = smov %s1119_s8  ;;  %s1331_s18 = smov %s975_s19 }
 0x18e   : > { %s1332_s19 = smov %s1334_s29  ;;  %24 = sbr.rel (!%p22_p10) target bundleno = 11 (0xb), region = 109 }
 0x195   :  { %517 = vsyncpa [#allocation3], 1 }
 0x196   :  { %519 = vsyncpa [#allocation3 + $0x1], 1 }
 0x197   :  { %520 = vsyncpa [#allocation6], 1 }
 0x198   :  { %521 = vsyncpa [#allocation4], 1 }
 0x199   :  { %523 = vsyncpa [#allocation4 + $0x1], 1 }
 0x19a   :  { %524 = vsyncpa [#allocation9], 1 }
 0x19b   :  { %526 = vsyncpa [#allocation9 + $0x1], 1 }

</bundles_post_ra>
